<compile_context>
chip_gen: v6e
topology: v6e:2x2x1
jax: 0.10.0
libtpu: 0.0.40
codegen_flags: <defaults>
</compile_context>

<pallas_src>
import jax
import jax.numpy as jnp
from jax.experimental import pallas as pl
from jax.experimental.pallas import tpu as pltpu


def _pad8(r):
    return (r + 7) // 8 * 8


def _round_up(x, m):
    return (x + m - 1) // m * m


def _vmem_capacity_bytes():
    """Generation-aware physical VMEM (v5e/v6e: 128 MiB, v7x: 64 MiB per TC)."""
    try:
        cap = int(pltpu.get_tpu_info().vmem_capacity_bytes)
        if cap > 0:
            return cap
    except Exception:
        pass
    return 64 << 20  # conservative fallback = smallest generation (v7x)


# ----------------------------- kernels --------------------------------------

def _conv1x1_ncw_kernel(x_ref, w_ref, b_ref, o_ref):
    # x_ref: (C_in, tn)  w_ref: (C_out, C_in)  b_ref: (C_out, 1)  o_ref: (C_out, tn)
    # Pointwise Conv1d == W @ X (+ bias), f32 MXU accumulation.  Output block is
    # lane-dense (point axis last, multiple of 128 or full N) -> unmasked stores.
    acc = jnp.dot(w_ref[...], x_ref[...], preferred_element_type=jnp.float32)
    o_ref[...] = (acc + b_ref[...]).astype(o_ref.dtype)


def _conv1x1_ncw_batched_kernel(x_ref, w_ref, b_ref, o_ref):
    # Small-N path: x_ref (Bt, C_in, N), o_ref (Bt, C_out, N); Bt is a small
    # static count -> unrolled, one tiny MXU dot per batch, stores lane-dense.
    w = w_ref[...]
    b = b_ref[...]
    for i in range(x_ref.shape[0]):
        acc = jnp.dot(w, x_ref[i], preferred_element_type=jnp.float32)
        o_ref[i] = (acc + b).astype(o_ref.dtype)


# ----------------------------- wrapper ---------------------------------------

def conv1d_k1_pallas(x_ncw, weight, bias, *, out_dtype=None, small_n_threshold=2048):
    """Exact equivalent of torch.nn.Conv1d(C_in, C_out, kernel_size=1) on NCW input.

    x_ncw:  (B, C_in, N) float32 (PyTorch NCW layout, kept as-is)
    weight: (C_out, C_in, 1)
    bias:   (C_out,)
    returns (B, C_out, N) in `out_dtype` (default: x dtype)
    """
    B, C_in, N = x_ncw.shape
    C_out = weight.shape[0]
    out_dtype = x_ncw.dtype if out_dtype is None else jnp.dtype(out_dtype)
    out_bytes = jnp.dtype(out_dtype).itemsize
    in_bytes = jnp.dtype(x_ncw.dtype).itemsize

    w = weight.reshape(C_out, C_in).astype(jnp.float32)   # tiny, VMEM-resident
    b = bias.reshape(C_out, 1).astype(jnp.float32)        # broadcasts over lanes

    cap = _vmem_capacity_bytes()
    budget = int(0.6 * cap)          # double-buffered tile budget, with headroom
    vmem_cap = int(0.75 * cap)       # hard cap on the scoped VMEM limit

    cost = pl.CostEstimate(
        flops=2 * B * C_out * C_in * N,
        transcendentals=0,
        bytes_accessed=(in_bytes * B * C_in * N
                        + out_bytes * B * C_out * N
                        + 4 * (C_out * C_in + C_out)),
    )
    # resident weight/bias footprint (both pad to (pad8(C_out), 128), 2 buffers)
    wb_bytes = 2 * 4 * 2 * _pad8(C_out) * 128

    if N <= small_n_threshold:
        # ---- small-N path: pack Bt batches per grid step ----
        lane_n = max(128, _round_up(N, 128))       # lane padding of the N axis
        per_batch = 2 * (_pad8(C_in) * lane_n * 4 + _pad8(C_out) * lane_n * out_bytes)
        bt_cap = max(1, min(B, 32, budget // max(per_batch, 1)))
        bt = 1
        for d in range(1, bt_cap + 1):              # largest divisor of B <= cap
            if B % d == 0:
                bt = d
        grid = (B // bt,)

        tile_bytes = per_batch * bt + wb_bytes
        vmem_limit = int(min(max(2 * tile_bytes, 4 << 20), vmem_cap))

        return pl.pallas_call(
            _conv1x1_ncw_batched_kernel,
            out_shape=jax.ShapeDtypeStruct((B, C_out, N), out_dtype),
            grid_spec=pltpu.PrefetchScalarGridSpec(
                num_scalar_prefetch=0,
                grid=grid,
                in_specs=[
                    pl.BlockSpec((bt, C_in, N), lambda i: (i, 0, 0)),
                    pl.BlockSpec((C_out, C_in), lambda i: (0, 0)),
                    pl.BlockSpec((C_out, 1), lambda i: (0, 0)),
                ],
                out_specs=pl.BlockSpec((bt, C_out, N), lambda i: (i, 0, 0)),
            ),
            compiler_params=pltpu.CompilerParams(
                dimension_semantics=("parallel",),
                vmem_limit_bytes=vmem_limit),
            cost_estimate=cost,
        )(x_ncw, w, b)

    # ---- large-N path: huge lane-dense point tiles, grid (B, N/tn) ----
    per_point = 2 * (_pad8(C_in) * 4 + _pad8(C_out) * out_bytes)  # double-buffered
    tn_max = max(128, (budget // per_point) // 128 * 128)
    nblk = 1 if tn_max >= N else pl.cdiv(N, tn_max)

    bytes_per_point = _pad8(C_in) * 4 + _pad8(C_out) * out_bytes
    per_prog_bytes = bytes_per_point * min(N, tn_max)
    if B * nblk == 1 and per_prog_bytes >= (2 << 20):
        nblk = 2          # feed both v7x TensorCores with >= 1 MiB each
    elif nblk > 1 and (B * nblk) % 2 == 1 and per_prog_bytes >= (2 << 20):
        nblk += 1         # even program count -> no tail step on one TC

    tn = N if nblk == 1 else min(N, _round_up(pl.cdiv(N, nblk), 128))
    grid = (B, pl.cdiv(N, tn))

    tile_bytes = 2 * (_pad8(C_in) * tn * 4 + _pad8(C_out) * tn * out_bytes) + wb_bytes
    vmem_limit = int(min(max(int(1.5 * tile_bytes), 4 << 20), vmem_cap))

    return pl.pallas_call(
        _conv1x1_ncw_kernel,
        out_shape=jax.ShapeDtypeStruct((B, C_out, N), out_dtype),
        grid_spec=pltpu.PrefetchScalarGridSpec(
            num_scalar_prefetch=0,
            grid=grid,
            in_specs=[
                # batch dim squeezed; (C_in, tn) block with the point axis on lanes
                pl.BlockSpec((None, C_in, tn), lambda bi, j: (bi, 0, j)),
                pl.BlockSpec((C_out, C_in), lambda bi, j: (0, 0)),
                pl.BlockSpec((C_out, 1), lambda bi, j: (0, 0)),
            ],
            out_specs=pl.BlockSpec((None, C_out, tn), lambda bi, j: (bi, 0, j)),
        ),
        compiler_params=pltpu.CompilerParams(
            dimension_semantics=("parallel", "parallel"),
            vmem_limit_bytes=vmem_limit),
        cost_estimate=cost,
    )(x_ncw, w, b)


# ----------------------------- model -----------------------------------------

class PointNeXtPallas:
    """JAX/Pallas port of the PointNeXt encoder forward pass."""

    def __init__(self, cfg, key):
        self.type = cfg['type']
        self.create_adapter = cfg['create_adapter']
        self.coor_dim = cfg['coor_dim']
        self.normal = cfg['normal']
        self.width = cfg['width']
        self.in_ch = self.coor_dim + self.coor_dim * self.normal

        k_w, k_b = jax.random.split(key)
        # deterministic init mimicking nn.Conv1d default (uniform in +-1/sqrt(fan_in))
        bound = 1.0 / (self.in_ch ** 0.5)
        self.mlp_weight = jax.random.uniform(
            k_w, (self.width, self.in_ch, 1), jnp.float32, minval=-bound, maxval=bound)
        self.mlp_bias = jax.random.uniform(
            k_b, (self.width,), jnp.float32, minval=-bound, maxval=bound)

        self.num_stages = len(cfg['npoint'])   # == 0 for the chosen config
        if self.num_stages != 0 or self.type != 'symmetry-regression' or self.create_adapter:
            # TODO(synk): Stage / FeaturePropagation / Head / build_mlp source not provided.
            raise NotImplementedError(
                "only the symmetry-regression / no-adapter / npoint=[] path is implemented")

    def forward(self, x, out_dtype=None):
        # x: (B, coor_dim*(1+normal), N)  -- PyTorch NCW layout (kept; no transposes)
        B, C, N = x.shape
        # l0_xyz (x[:, :coor_dim, :]) is intentionally NOT materialised: nothing in
        # the symmetry-regression / no-adapter / no-stage path consumes it.
        l0_points = x if C == self.in_ch else x[:, :self.in_ch, :]
        l0_points = conv1d_k1_pallas(
            l0_points, self.mlp_weight, self.mlp_bias, out_dtype=out_dtype)
        total = B * self.width * N
        assert total % 1024 == 0, (
            f"reshape(-1, 1024) requires B*width*N divisible by 1024, got {total}")
        # contiguous NCW output -> this reshape is a free metadata op
        points_cls = l0_points.reshape(-1, 1024)
        return points_cls


if __name__ == "__main__":
    cfg = dict(
        type='symmetry-regression',
        create_adapter=False,
        coor_dim=3,
        normal=1,        # -> in_channels = 6
        width=32,
        adapter_div=2,
        npoint=[],       # no Stage blocks (their source was not provided)
        radius_list=[],
        nsample_list=[],
        expansion=4,
    )

    key = jax.random.PRNGKey(0)
    k_param, k_x, k_x2 = jax.random.split(key, 3)

    model = PointNeXtPallas(cfg, k_param)
    w2d = model.mlp_weight[:, :, 0]                            # (C_out, C_in)

    # ---- check 1: small-N / batch-packed path (B=2, N=128) ----
    B, N = 2, 128                      # B*width*N = 8192 -> reshape(-1, 1024) ok
    C = cfg['coor_dim'] * (1 + cfg['normal'])
    x = jax.random.normal(k_x, (B, C, N), jnp.float32)

    out = jax.block_until_ready(model.forward(x))
    ref = (jnp.einsum('oc,bcn->bon', w2d, x) + model.mlp_bias[None, :, None])
    ref = ref.reshape(-1, 1024)
    assert out.shape == ref.shape, (out.shape, ref.shape)
    assert jnp.allclose(out, ref, atol=1e-4, rtol=1e-4), float(
        jnp.max(jnp.abs(out - ref)))

    # ---- check 2: large-N / lane-tiled path (B=1, N=2176 > threshold) ----
    B2, N2 = 1, 2176
    x2 = jax.random.normal(k_x2, (B2, C, N2), jnp.float32)
    out2 = jax.block_until_ready(
        conv1d_k1_pallas(x2, model.mlp_weight, model.mlp_bias))
    ref2 = jnp.einsum('oc,bcn->bon', w2d, x2) + model.mlp_bias[None, :, None]
    assert out2.shape == ref2.shape, (out2.shape, ref2.shape)
    assert jnp.allclose(out2, ref2, atol=1e-4, rtol=1e-4), float(
        jnp.max(jnp.abs(out2 - ref2)))

    print("KERNEL_OK")
</pallas_src>

<mosaic_0001>
module attributes {stable_mosaic.version = 11 : i64} {
  func.func @_conv1x1_ncw_batched_kernel(%arg0: i32, %arg1: memref<2x6x128xf32, #tpu.memory_space<vmem>>, %arg2: memref<32x6xf32, #tpu.memory_space<vmem>>, %arg3: memref<32x1xf32, #tpu.memory_space<vmem>>, %arg4: memref<2x32x128xf32, #tpu.memory_space<vmem>>) attributes {dimension_semantics = [#tpu.dimension_semantics<parallel>], iteration_bounds = array<i64: 1>, scalar_prefetch = 0 : i64, scratch_operands = 0 : i64, tpu.core_type = #tpu.core_type<tc>, window_params = [{transform_indices = @transform_0, window_bounds = array<i64: 2, 6, 128>}, {pipeline_mode = #tpu.pipeline_mode<synchronous>, transform_indices = @transform_1, window_bounds = array<i64: 32, 6>}, {pipeline_mode = #tpu.pipeline_mode<synchronous>, transform_indices = @transform_2, window_bounds = array<i64: 32, 1>}, {transform_indices = @transform_3, window_bounds = array<i64: 2, 32, 128>}]} {
    %c0 = arith.constant 0 : index
    %c0_0 = arith.constant 0 : index
    %0 = vector.load %arg2[%c0, %c0_0] : memref<32x6xf32, #tpu.memory_space<vmem>>, vector<32x6xf32>
    %c0_1 = arith.constant 0 : index
    %c0_2 = arith.constant 0 : index
    %1 = vector.load %arg3[%c0_1, %c0_2] : memref<32x1xf32, #tpu.memory_space<vmem>>, vector<32x1xf32>
    %c0_3 = arith.constant 0 : index
    %c0_4 = arith.constant 0 : index
    %c0_5 = arith.constant 0 : index
    %2 = vector.load %arg1[%c0_3, %c0_4, %c0_5] : memref<2x6x128xf32, #tpu.memory_space<vmem>>, vector<1x6x128xf32>
    %3 = vector.shape_cast %2 : vector<1x6x128xf32> to vector<6x128xf32>
    %cst = arith.constant dense<0.000000e+00> : vector<32x128xf32>
    %4 = tpu.matmul %0, %3, %cst {dimension_numbers = #tpu.dot_dimension_numbers<[1], [0], [0], [1], [0, 0, 1, 1], [], []>} : vector<32x6xf32>, vector<6x128xf32>, vector<32x128xf32> -> vector<32x128xf32>
    %5 = vector.broadcast %1 : vector<32x1xf32> to vector<32x128xf32>
    %6 = arith.addf %4, %5 : vector<32x128xf32>
    %c0_6 = arith.constant 0 : index
    %c0_7 = arith.constant 0 : index
    %c0_8 = arith.constant 0 : index
    %7 = vector.load %arg4[%c0_6, %c0_7, %c0_8] : memref<2x32x128xf32, #tpu.memory_space<vmem>>, vector<1x32x128xf32>
    %8 = vector.shape_cast %7 : vector<1x32x128xf32> to vector<32x128xf32>
    %9 = vector.shape_cast %6 : vector<32x128xf32> to vector<1x32x128xf32>
    tpu.vector_store %arg4[%c0_6, %c0_7, %c0_8], %9 {strides = array<i32>} : memref<2x32x128xf32, #tpu.memory_space<vmem>>, vector<1x32x128xf32>,
    %c1 = arith.constant 1 : index
    %c0_9 = arith.constant 0 : index
    %c0_10 = arith.constant 0 : index
    %10 = vector.load %arg1[%c1, %c0_9, %c0_10] : memref<2x6x128xf32, #tpu.memory_space<vmem>>, vector<1x6x128xf32>
    %11 = vector.shape_cast %10 : vector<1x6x128xf32> to vector<6x128xf32>
    %cst_11 = arith.constant dense<0.000000e+00> : vector<32x128xf32>
    %12 = tpu.matmul %0, %11, %cst_11 {dimension_numbers = #tpu.dot_dimension_numbers<[1], [0], [0], [1], [0, 0, 1, 1], [], []>} : vector<32x6xf32>, vector<6x128xf32>, vector<32x128xf32> -> vector<32x128xf32>
    %13 = vector.broadcast %1 : vector<32x1xf32> to vector<32x128xf32>
    %14 = arith.addf %12, %13 : vector<32x128xf32>
    %c1_12 = arith.constant 1 : index
    %c0_13 = arith.constant 0 : index
    %c0_14 = arith.constant 0 : index
    %15 = vector.load %arg4[%c1_12, %c0_13, %c0_14] : memref<2x32x128xf32, #tpu.memory_space<vmem>>, vector<1x32x128xf32>
    %16 = vector.shape_cast %15 : vector<1x32x128xf32> to vector<32x128xf32>
    %17 = vector.shape_cast %14 : vector<32x128xf32> to vector<1x32x128xf32>
    tpu.vector_store %arg4[%c1_12, %c0_13, %c0_14], %17 {strides = array<i32>} : memref<2x32x128xf32, #tpu.memory_space<vmem>>, vector<1x32x128xf32>,
    return
  }
  func.func @transform_0(%arg0: i32) -> (i32, i32, i32) {
    %c0_i32 = arith.constant 0 : i32
    %c0_i32_0 = arith.constant 0 : i32
    %c0_i32_1 = arith.constant 0 : i32
    return %arg0, %c0_i32, %c0_i32_0 : i32, i32, i32
  }
  func.func @transform_1(%arg0: i32) -> (i32, i32) {
    %c0_i32 = arith.constant 0 : i32
    %c0_i32_0 = arith.constant 0 : i32
    %c0_i32_1 = arith.constant 0 : i32
    return %c0_i32, %c0_i32_0 : i32, i32
  }
  func.func @transform_2(%arg0: i32) -> (i32, i32) {
    %c0_i32 = arith.constant 0 : i32
    %c0_i32_0 = arith.constant 0 : i32
    %c0_i32_1 = arith.constant 0 : i32
    return %c0_i32, %c0_i32_0 : i32, i32
  }
  func.func @transform_3(%arg0: i32) -> (i32, i32, i32) {
    %c0_i32 = arith.constant 0 : i32
    %c0_i32_0 = arith.constant 0 : i32
    %c0_i32_1 = arith.constant 0 : i32
    return %arg0, %c0_i32, %c0_i32_0 : i32, i32, i32
  }
}

</mosaic_0001>

<bundles_post_ra>
// kernel: tpu_custom_call.1
= control target key start
LH: loop header
LB: loop body
LE: loop exit
PB: predicated region body
PF: predicated region fallthrough
CT: control target
= control target key end

     0   :  { %vm57_vm0 = vcmask 1045504   ;;  %vm44_vm1 = vcmask 48128   ;;  %s391_s0 = inlined_call_operand.vmem [shape: f32[2,6,128], index: 0, kind: input, shape index: {}]   ;;  %s392_s1 = inlined_call_operand.vmem [shape: f32[32,6], index: 1, kind: input, shape index: {}]   ;;  %s393_s2 = inlined_call_operand.vmem [shape: f32[32,1], index: 2, kind: input, shape index: {}]   ;;  %s394_s3 = inlined_call_operand.hbm [shape: f32[2,32,128], index: 3, kind: output, shape index: {}]  }
   0x1   :  { %v23_v0 = vld [vmem:[%s391_s0] sm:$0x3f]  ;;  %v266_v1 = vld [vmem:[%s391_s0 + $0x8] sm:$0x3f]  ;;  %v17_v4 = vld [vmem:[%s392_s1 + $0x10] sm:$0xff] }
   0x2   :  { %v15_v2 = vld [vmem:[%s392_s1] sm:$0xff]  ;;  %282 = vmatprep.subr.msk.mxu0 %vm57_vm0, %v23_v0  ;;  %290 = vmatprep.subr.msk.mxu1 %vm57_vm0, %v266_v1  ;;  %v16_v3 = vld [vmem:[%s392_s1 + $0x8] sm:$0xff] }
   0x3   :  { %283 = vmatpush3.msk.msra.mxu0 %vm57_vm0, %v23_v0  ;;  %284 = vmatprep.mubr.msk.f32.mxu0 %vm44_vm1, %v15_v2 }
   0x4   :  { %291 = vmatpush3.msk.msra.mxu1 %vm57_vm0, %v266_v1  ;;  %292 = vmatprep.mubr.msk.f32.mxu1 %vm44_vm1, %v15_v2 }
   0x5   :  { %8 = vsyncpa [#allocation3], 0  ;;  %285 = vmatmul.mubr.msk.f32.vlgmr.msra.gmra.mxu0 %vm44_vm1, %v16_v3  ;;  %293 = vmatmul.mubr.msk.f32.vlgmr.msra.gmra.mxu1 %vm44_vm1, %v16_v3  ;;  %v19_v5 = vld [vmem:[%s393_s2] sm:$0xff]  ;;  %v21_v6 = vld [vmem:[%s393_s2 + $0x10] sm:$0xff]  ;;  %v326_v8 = vmov 0  }
   0x6   :  { %287 = vmatprep.mubr.msk.f32.mxu0 %vm44_vm1, %v17_v4  ;;  %295 = vmatprep.mubr.msk.f32.mxu1 %vm44_vm1, %v17_v4  ;;  %v18_v7 = vld [vmem:[%s392_s1 + $0x18] sm:$0xff]  ;;  %v20_v9 = vld [vmem:[%s393_s2 + $0x8] sm:$0xff]  ;;  %s327_s1 = smov [#allocation2]  }
   0x7   :  { %302 = vset.pattern.permute.xlu0 %v326_v8  ;;  %303 = vset.pattern.permute.xlu1 %v326_v8  ;;  %v22_v10 = vld [vmem:[%s393_s2 + $0x18] sm:$0xff]  ;;  %s250_s4 = sshll.u32 %s327_s1, 4  ;;  %s251_s4 = int_to_ptr.vmem [resolvable:$true] %s250_s4 }
   0x8   :  { %26 = vperm.xlu0 %302, %v19_v5   ;;  %36 = vperm.xlu1 %303, %v21_v6   ;;  %s304_s2 = scalar_lea.vmem %s251_s4, 1024  ;;  %p309_p1 = scmp.lt.s32.totalorder %s251_s4, %s251_s4 }
   0x9   :  { %288 = vmatmul.mubr.msk.f32.gmra.mxu0 %vm44_vm1, %v18_v7  ;;  %296 = vmatmul.mubr.msk.f32.gmra.mxu1 %vm44_vm1, %v18_v7  ;;  %p305_p0 = scmp.ne.s32.totalorder %s251_s4, %s304_s2  ;;  %p310_p2 = scmp.lt.s32.totalorder %s304_s2, %s304_s2 }
   0xb   :  { %p311_p3 = por %p310_p2, %p309_p1 }
   0xc   :  { %31 = vperm.xlu0 %302, %v20_v9   ;;  %41 = vperm.xlu1 %303, %v22_v10  }
   0xd   :  { %p312_p4 = pnand %p311_p3, %p305_p0 }
  0x83   :  { %v27_v11 = vpop.permute.xlu0 %26  ;;  %v37_v12 = vpop.permute.xlu1 %36 }
  0x87   :  { %v32_v13 = vpop.permute.xlu0 %31  ;;  %v42_v20 = vpop.permute.xlu1 %41 }
  0xc5   :  { %v286_v14 = vpop.f32.mrf.mxu0  ;;  %v294_v15 = vpop.f32.mrf.mxu1 }
  0xc6   :  { %v133_v16 = vadd.f32 %v286_v14, %v32_v13  ;;  %v227_v17 = vadd.f32 %v294_v15, %v32_v13 }
  0xc7   :  { %v127_v18 = vpop.f32.mrf.mxu0  ;;  %v221_v19 = vpop.f32.mrf.mxu1 }
  0xc8   :  { %147 = vst [vmem:[#allocation2 + $0x8] sm:$0xff] %v133_v16  ;;  %242 = vst [vmem:[#allocation2 + $0x28] sm:$0xff] %v227_v17  ;;  %v128_v21 = vadd.f32 %v127_v18, %v27_v11  ;;  %v222_v22 = vadd.f32 %v221_v19, %v27_v11 }
  0xc9   :  { %v289_v23 = vpop.f32.mrf.mxu0  ;;  %v297_v24 = vpop.f32.mrf.mxu1 }
  0xca   :  { %146 = vst [vmem:[#allocation2] sm:$0xff] %v128_v21  ;;  %241 = vst [vmem:[#allocation2 + $0x20] sm:$0xff] %v222_v22  ;;  %v143_v25 = vadd.f32 %v289_v23, %v42_v20  ;;  %v237_v26 = vadd.f32 %v297_v24, %v42_v20 }
  0xcb   :  { %v137_v27 = vpop.f32.mrf.mxu0  ;;  %v231_v28 = vpop.f32.mrf.mxu1 }
  0xcc   :  { %149 = vst [vmem:[#allocation2 + $0x18] sm:$0xff] %v143_v25  ;;  %244 = vst [vmem:[#allocation2 + $0x38] sm:$0xff] %v237_v26  ;;  %v138_v29 = vadd.f32 %v137_v27, %v37_v12  ;;  %v232_v30 = vadd.f32 %v231_v28, %v37_v12 }
  0xce   :  { %148 = vst [vmem:[#allocation2 + $0x10] sm:$0xff] %v138_v29  ;;  %243 = vst [vmem:[#allocation2 + $0x30] sm:$0xff] %v232_v30 }
  0xcf   :  { %315 = shalt.err (!%p312_p4)
}
  0xd0   :  { %s328_s5 = smov 128   ;;  %s329_s6 = smov 8  }
  0xd1   :  { %256 = dma.vmem_to_hbm [thread:$0]  %s251_s4, 1024, %s394_s3, [#allocation3], %s328_s5, %s328_s5, %s329_s6  }
  0xd2   :  { %324 = dma.done.wait [#allocation3], 1024  }
  0xd3   :  { %325 = vsyncadd [#allocation3], 4294966272 }
  0xd4   :  { %260 = vsyncpa [#allocation3], 1 }

</bundles_post_ra>
